<compile_context>
chip_gen: v7x
topology: tpu7x:2x2x1
jax: 0.10.0
libtpu: 0.0.40
codegen_flags: <defaults>
</compile_context>

<pallas_src>
import jax
import jax.numpy as jnp
from jax.experimental import pallas as pl
from jax.experimental.pallas import tpu as pltpu


def _round_up(x, m):
    return ((x + m - 1) // m) * m


def _categorical_latent_kernel(h_ref, w1_ref, b1_ref, w2_ref, b2_ref,
                               w3_ref, b3_ref, out_ref):
    """Fused 3-layer MLP + mean-centering + softmax (OneHotCategorical probs)
    for one (TB, input_size) batch tile. out_ref is (2, TB, K):
    slot 0 = mean-zero logits, slot 1 = probs."""
    x = h_ref[...]

    # Linear(input_size, 128) + ReLU  (MXU matmul, f32 accumulate)
    h1 = jnp.dot(x, w1_ref[...], preferred_element_type=jnp.float32)
    h1 = jnp.maximum(h1 + b1_ref[...].astype(jnp.float32), 0.0)

    # Linear(128, 64) + ReLU
    h2 = jnp.dot(h1.astype(w2_ref.dtype), w2_ref[...],
                 preferred_element_type=jnp.float32)
    h2 = jnp.maximum(h2 + b2_ref[...].astype(jnp.float32), 0.0)

    # Dropout(0.1): identity at inference (eval semantics).
    # TODO(synk): training-mode dropout mask / z_logit_clip clamp not emitted.

    # Linear(64, K)
    lg = jnp.dot(h2.astype(w3_ref.dtype), w3_ref[...],
                 preferred_element_type=jnp.float32)
    lg = lg + b3_ref[...].astype(jnp.float32)

    # OneHotCategorical(logits).probs == softmax(logits). Softmax is
    # shift-invariant, so compute it from the un-centered logits directly.
    # Exact denominator: probs should sum to 1 for downstream sampling / KL.
    m = jnp.max(lg, axis=-1, keepdims=True)
    e = jnp.exp(lg - m)
    probs = e / jnp.sum(e, axis=-1, keepdims=True)

    # Single fused output stream: one DMA / one store epilogue per tile.
    out_ref[0, :, :] = lg - jnp.mean(lg, axis=-1, keepdims=True)
    out_ref[1, :, :] = probs


def _choose_batch_tile(B, sublane_mult, block_b):
    """Generation-aware batch tile (rows per grid step)."""
    try:
        kind = jax.devices()[0].device_kind.lower()
    except Exception:  # pragma: no cover - defensive
        kind = ""
    is_v7 = "v7" in kind
    if block_b is None:
        # v7x HBM (~3.2 TB/s) hides ~1 MB behind the ~0.35us/step overhead,
        # so it wants thousands of rows/step; 2048 rows already puts
        # v5e/v6e well onto the HBM roofline for this byte/row count.
        block_b = 4096 if is_v7 else 2048
    tb = min(_round_up(block_b, sublane_mult), _round_up(B, sublane_mult))
    if is_v7:
        # Keep >= 2 grid steps when B allows it so dimension_semantics
        # ("parallel",) can shard the batch axis across the two TensorCores.
        tb = min(tb, max(_round_up(pl.cdiv(B, 2), sublane_mult), sublane_mult))
    return max(tb, sublane_mult)


def categorical_latent_forward(h, params, *, use_bf16=True, block_b=None):
    """Runs the fused kernel.

    h: (B, input_size) f32. Returns (logits, probs), each (B, N=1, K) f32.
    use_bf16: cast h / weights to bf16 for the MXU (default; v6e/v7x native
              dense format, also fine on v5e since all elementwise work is
              f32). Accumulation, bias, ReLU, mean and softmax stay in f32.
    block_b:  batch tile size override (rows per grid step).
    """
    w1, b1, w2, b2, w3, b3 = params
    B, in_size = h.shape
    K = w3.shape[1]

    if use_bf16:
        h = h.astype(jnp.bfloat16)
        w1 = w1.astype(jnp.bfloat16)
        w2 = w2.astype(jnp.bfloat16)
        w3 = w3.astype(jnp.bfloat16)
        # biases stay f32 (added to the f32 accumulator).

    # bf16 sublane tile is (16, 128); f32 is (8, 128).
    sublane_mult = 16 if use_bf16 else 8
    tb = _choose_batch_tile(B, sublane_mult, block_b)
    grid = (pl.cdiv(B, tb),)

    # Weights/biases: constant block index -> stay resident in VMEM across
    # all batch tiles (no re-DMA per step). Total resident footprint ~55 KB.
    def resident(shape):
        return pl.BlockSpec(shape, lambda i: (0,) * len(shape))

    # Advisory cost hint for XLA's scheduler around this custom call.
    flops = 2 * B * (in_size * 128 + 128 * 64 + 64 * K)
    bytes_accessed = (
        int(h.size) * h.dtype.itemsize
        + sum(int(p.size) * p.dtype.itemsize for p in (w1, b1, w2, b2, w3, b3))
        + 2 * B * K * 4)  # fused (2, B, K) f32 output

    fused = pl.pallas_call(
        _categorical_latent_kernel,
        out_shape=jax.ShapeDtypeStruct((2, B, K), jnp.float32),
        grid=grid,
        in_specs=[
            pl.BlockSpec((tb, in_size), lambda i: (i, 0)),   # h tile
            resident(w1.shape), resident(b1.shape),
            resident(w2.shape), resident(b2.shape),
            resident(w3.shape), resident(b3.shape),
        ],
        out_specs=pl.BlockSpec((2, tb, K), lambda i: (0, i, 0)),
        compiler_params=pltpu.CompilerParams(
            dimension_semantics=("parallel",)),   # 2-TC sharding on v7x
        cost_estimate=pl.CostEstimate(flops=flops, transcendentals=B * K,
                                      bytes_accessed=bytes_accessed),
    )(h, w1, b1, w2, b2, w3, b3)

    N = 1
    logits = fused[0].reshape(-1, N, K)   # torch.reshape(h, (-1, N, K)) - mean
    probs = fused[1].reshape(-1, N, K)
    return logits, probs


def init_params(key, input_size, latent_dim):
    """Deterministic PyTorch-nn.Linear-style init (uniform +/- 1/sqrt(fan_in)).
    Weights stored as (in_features, out_features)."""
    dims = [(input_size, 128), (128, 64), (64, latent_dim)]
    params = []
    for (fan_in, fan_out) in dims:
        key, kw, kb = jax.random.split(key, 3)
        bound = 1.0 / jnp.sqrt(fan_in)
        w = jax.random.uniform(kw, (fan_in, fan_out), jnp.float32, -bound, bound)
        b = jax.random.uniform(kb, (1, fan_out), jnp.float32, -bound, bound)
        params += [w, b]
    return tuple(params)


def reference_forward(h, params):
    w1, b1, w2, b2, w3, b3 = params
    x = jnp.maximum(h @ w1 + b1, 0.0)
    x = jnp.maximum(x @ w2 + b2, 0.0)
    lg = x @ w3 + b3
    lg = lg.reshape(-1, 1, w3.shape[1])
    lg = lg - jnp.mean(lg, axis=-1, keepdims=True)
    pr = jax.nn.softmax(lg, axis=-1)
    return lg, pr


if __name__ == "__main__":
    B = 16           # batch
    INPUT_SIZE = 32  # encoder hidden size
    LATENT_DIM = 25  # cfg.LATENT_DIM (K); N = 1

    key = jax.random.PRNGKey(0)
    key, kh = jax.random.split(key)
    h = jax.random.normal(kh, (B, INPUT_SIZE), dtype=jnp.float32)
    params = init_params(key, INPUT_SIZE, LATENT_DIM)

    ref_logits, ref_probs = reference_forward(h, params)

    # Exact f32 path: tight numerical check against the pure-JAX reference.
    logits32, probs32 = categorical_latent_forward(h, params, use_bf16=False)
    logits32 = jax.block_until_ready(logits32)
    probs32 = jax.block_until_ready(probs32)
    assert logits32.shape == (B, 1, LATENT_DIM)
    assert probs32.shape == (B, 1, LATENT_DIM)
    assert jnp.allclose(logits32, ref_logits, atol=1e-4, rtol=1e-4)
    assert jnp.allclose(probs32, ref_probs, atol=1e-5, rtol=1e-4)

    # Default path (bf16 MXU inputs, f32 accumulation / softmax): looser
    # tolerance to cover bf16 matmul rounding.
    logits, probs = categorical_latent_forward(h, params)
    logits = jax.block_until_ready(logits)
    probs = jax.block_until_ready(probs)
    assert logits.shape == (B, 1, LATENT_DIM)
    assert probs.shape == (B, 1, LATENT_DIM)
    assert jnp.allclose(logits, ref_logits, atol=5e-2, rtol=5e-2)
    assert jnp.allclose(probs, ref_probs, atol=1e-2, rtol=5e-2)
    assert jnp.allclose(jnp.sum(probs, axis=-1), 1.0, atol=1e-5)

    print("KERNEL_OK")
</pallas_src>

<mosaic_0001>
module attributes {stable_mosaic.version = 11 : i64} {
  func.func @_categorical_latent_kernel(%arg0: i32, %arg1: memref<16x32xf32, #tpu.memory_space<vmem>>, %arg2: memref<32x128xf32, #tpu.memory_space<vmem>>, %arg3: memref<1x128xf32, #tpu.memory_space<vmem>>, %arg4: memref<128x64xf32, #tpu.memory_space<vmem>>, %arg5: memref<1x64xf32, #tpu.memory_space<vmem>>, %arg6: memref<64x25xf32, #tpu.memory_space<vmem>>, %arg7: memref<1x25xf32, #tpu.memory_space<vmem>>, %arg8: memref<2x16x25xf32, #tpu.memory_space<vmem>>) attributes {dimension_semantics = [#tpu.dimension_semantics<parallel>], iteration_bounds = array<i64: 1>, scalar_prefetch = 0 : i64, scratch_operands = 0 : i64, tpu.core_type = #tpu.core_type<tc>, window_params = [{transform_indices = @transform_0, window_bounds = array<i64: 16, 32>}, {pipeline_mode = #tpu.pipeline_mode<synchronous>, transform_indices = @transform_1, window_bounds = array<i64: 32, 128>}, {pipeline_mode = #tpu.pipeline_mode<synchronous>, transform_indices = @transform_2, window_bounds = array<i64: 1, 128>}, {pipeline_mode = #tpu.pipeline_mode<synchronous>, transform_indices = @transform_3, window_bounds = array<i64: 128, 64>}, {pipeline_mode = #tpu.pipeline_mode<synchronous>, transform_indices = @transform_4, window_bounds = array<i64: 1, 64>}, {pipeline_mode = #tpu.pipeline_mode<synchronous>, transform_indices = @transform_5, window_bounds = array<i64: 64, 25>}, {pipeline_mode = #tpu.pipeline_mode<synchronous>, transform_indices = @transform_6, window_bounds = array<i64: 1, 25>}, {transform_indices = @transform_7, window_bounds = array<i64: 2, 16, 25>}]} {
    %c0 = arith.constant 0 : index
    %c0_0 = arith.constant 0 : index
    %0 = vector.load %arg1[%c0, %c0_0] : memref<16x32xf32, #tpu.memory_space<vmem>>, vector<16x32xf32>
    %c0_1 = arith.constant 0 : index
    %c0_2 = arith.constant 0 : index
    %1 = vector.load %arg2[%c0_1, %c0_2] : memref<32x128xf32, #tpu.memory_space<vmem>>, vector<32x128xf32>
    %cst = arith.constant dense<0.000000e+00> : vector<16x128xf32>
    %2 = tpu.matmul %0, %1, %cst {dimension_numbers = #tpu.dot_dimension_numbers<[1], [0], [0], [1], [0, 0, 1, 1], [], []>} : vector<16x32xf32>, vector<32x128xf32>, vector<16x128xf32> -> vector<16x128xf32>
    %c0_3 = arith.constant 0 : index
    %c0_4 = arith.constant 0 : index
    %3 = vector.load %arg3[%c0_3, %c0_4] : memref<1x128xf32, #tpu.memory_space<vmem>>, vector<1x128xf32>
    %4 = vector.broadcast %3 : vector<1x128xf32> to vector<16x128xf32>
    %5 = arith.addf %2, %4 : vector<16x128xf32>
    %cst_5 = arith.constant 0.000000e+00 : f32
    %6 = vector.broadcast %cst_5 : f32 to vector<16x128xf32>
    %7 = arith.maximumf %5, %6 : vector<16x128xf32>
    %c0_6 = arith.constant 0 : index
    %c0_7 = arith.constant 0 : index
    %8 = vector.load %arg4[%c0_6, %c0_7] : memref<128x64xf32, #tpu.memory_space<vmem>>, vector<128x64xf32>
    %cst_8 = arith.constant dense<0.000000e+00> : vector<16x64xf32>
    %9 = tpu.matmul %7, %8, %cst_8 {dimension_numbers = #tpu.dot_dimension_numbers<[1], [0], [0], [1], [0, 0, 1, 1], [], []>} : vector<16x128xf32>, vector<128x64xf32>, vector<16x64xf32> -> vector<16x64xf32>
    %c0_9 = arith.constant 0 : index
    %c0_10 = arith.constant 0 : index
    %10 = vector.load %arg5[%c0_9, %c0_10] : memref<1x64xf32, #tpu.memory_space<vmem>>, vector<1x64xf32>
    %11 = vector.broadcast %10 : vector<1x64xf32> to vector<16x64xf32>
    %12 = arith.addf %9, %11 : vector<16x64xf32>
    %cst_11 = arith.constant 0.000000e+00 : f32
    %13 = vector.broadcast %cst_11 : f32 to vector<16x64xf32>
    %14 = arith.maximumf %12, %13 : vector<16x64xf32>
    %c0_12 = arith.constant 0 : index
    %c0_13 = arith.constant 0 : index
    %15 = vector.load %arg6[%c0_12, %c0_13] : memref<64x25xf32, #tpu.memory_space<vmem>>, vector<64x25xf32>
    %cst_14 = arith.constant dense<0.000000e+00> : vector<16x25xf32>
    %16 = tpu.matmul %14, %15, %cst_14 {dimension_numbers = #tpu.dot_dimension_numbers<[1], [0], [0], [1], [0, 0, 1, 1], [], []>} : vector<16x64xf32>, vector<64x25xf32>, vector<16x25xf32> -> vector<16x25xf32>
    %c0_15 = arith.constant 0 : index
    %c0_16 = arith.constant 0 : index
    %17 = vector.load %arg7[%c0_15, %c0_16] : memref<1x25xf32, #tpu.memory_space<vmem>>, vector<1x25xf32>
    %18 = vector.broadcast %17 : vector<1x25xf32> to vector<16x25xf32>
    %19 = arith.addf %16, %18 : vector<16x25xf32>
    %cst_17 = arith.constant dense<0xFF800000> : vector<16xf32>
    %20 = vector.multi_reduction <maximumf>, %19, %cst_17 [1] : vector<16x25xf32> to vector<16xf32>
    %21 = vector.shape_cast %20 : vector<16xf32> to vector<16x1xf32>
    %22 = vector.broadcast %21 : vector<16x1xf32> to vector<16x25xf32>
    %23 = arith.subf %19, %22 : vector<16x25xf32>
    %24 = math.exp %23 : vector<16x25xf32>
    %cst_18 = arith.constant dense<0.000000e+00> : vector<16xf32>
    %25 = vector.multi_reduction <add>, %24, %cst_18 [1] : vector<16x25xf32> to vector<16xf32>
    %26 = vector.shape_cast %25 : vector<16xf32> to vector<16x1xf32>
    %27 = vector.broadcast %26 : vector<16x1xf32> to vector<16x25xf32>
    %28 = arith.divf %24, %27 : vector<16x25xf32>
    %cst_19 = arith.constant dense<0.000000e+00> : vector<16xf32>
    %29 = vector.multi_reduction <add>, %19, %cst_19 [1] : vector<16x25xf32> to vector<16xf32>
    %30 = vector.shape_cast %29 : vector<16xf32> to vector<16x1xf32>
    %cst_20 = arith.constant 2.500000e+01 : f32
    %31 = vector.broadcast %cst_20 : f32 to vector<16x1xf32>
    %32 = arith.divf %30, %31 : vector<16x1xf32>
    %33 = vector.broadcast %32 : vector<16x1xf32> to vector<16x25xf32>
    %34 = arith.subf %19, %33 : vector<16x25xf32>
    %c0_21 = arith.constant 0 : index
    %c0_22 = arith.constant 0 : index
    %c0_23 = arith.constant 0 : index
    %35 = vector.load %arg8[%c0_21, %c0_22, %c0_23] : memref<2x16x25xf32, #tpu.memory_space<vmem>>, vector<1x16x25xf32>
    %36 = vector.shape_cast %35 : vector<1x16x25xf32> to vector<16x25xf32>
    %37 = vector.shape_cast %34 : vector<16x25xf32> to vector<1x16x25xf32>
    tpu.vector_store %arg8[%c0_21, %c0_22, %c0_23], %37 {strides = array<i32>} : memref<2x16x25xf32, #tpu.memory_space<vmem>>, vector<1x16x25xf32>,
    %c1 = arith.constant 1 : index
    %c0_24 = arith.constant 0 : index
    %c0_25 = arith.constant 0 : index
    %38 = vector.load %arg8[%c1, %c0_24, %c0_25] : memref<2x16x25xf32, #tpu.memory_space<vmem>>, vector<1x16x25xf32>
    %39 = vector.shape_cast %38 : vector<1x16x25xf32> to vector<16x25xf32>
    %40 = vector.shape_cast %28 : vector<16x25xf32> to vector<1x16x25xf32>
    tpu.vector_store %arg8[%c1, %c0_24, %c0_25], %40 {strides = array<i32>} : memref<2x16x25xf32, #tpu.memory_space<vmem>>, vector<1x16x25xf32>,
    return
  }
  func.func @transform_0(%arg0: i32) -> (i32, i32) {
    %c0_i32 = arith.constant 0 : i32
    %c0_i32_0 = arith.constant 0 : i32
    return %arg0, %c0_i32 : i32, i32
  }
  func.func @transform_1(%arg0: i32) -> (i32, i32) {
    %c0_i32 = arith.constant 0 : i32
    %c0_i32_0 = arith.constant 0 : i32
    %c0_i32_1 = arith.constant 0 : i32
    return %c0_i32, %c0_i32_0 : i32, i32
  }
  func.func @transform_2(%arg0: i32) -> (i32, i32) {
    %c0_i32 = arith.constant 0 : i32
    %c0_i32_0 = arith.constant 0 : i32
    %c0_i32_1 = arith.constant 0 : i32
    return %c0_i32, %c0_i32_0 : i32, i32
  }
  func.func @transform_3(%arg0: i32) -> (i32, i32) {
    %c0_i32 = arith.constant 0 : i32
    %c0_i32_0 = arith.constant 0 : i32
    %c0_i32_1 = arith.constant 0 : i32
    return %c0_i32, %c0_i32_0 : i32, i32
  }
  func.func @transform_4(%arg0: i32) -> (i32, i32) {
    %c0_i32 = arith.constant 0 : i32
    %c0_i32_0 = arith.constant 0 : i32
    %c0_i32_1 = arith.constant 0 : i32
    return %c0_i32, %c0_i32_0 : i32, i32
  }
  func.func @transform_5(%arg0: i32) -> (i32, i32) {
    %c0_i32 = arith.constant 0 : i32
    %c0_i32_0 = arith.constant 0 : i32
    %c0_i32_1 = arith.constant 0 : i32
    return %c0_i32, %c0_i32_0 : i32, i32
  }
  func.func @transform_6(%arg0: i32) -> (i32, i32) {
    %c0_i32 = arith.constant 0 : i32
    %c0_i32_0 = arith.constant 0 : i32
    %c0_i32_1 = arith.constant 0 : i32
    return %c0_i32, %c0_i32_0 : i32, i32
  }
  func.func @transform_7(%arg0: i32) -> (i32, i32, i32) {
    %c0_i32 = arith.constant 0 : i32
    %c0_i32_0 = arith.constant 0 : i32
    %c0_i32_1 = arith.constant 0 : i32
    return %c0_i32, %arg0, %c0_i32_0 : i32, i32, i32
  }
}

</mosaic_0001>

<bundles_post_ra>
// kernel: tpu_custom_call.1
= control target key start
LH: loop header
LB: loop body
LE: loop exit
PB: predicated region body
PF: predicated region fallthrough
CT: control target
= control target key end

     0   :  { %vm40_vm0 = vcmask 261120   ;;  %s739_s0 = inlined_call_operand.vmem [shape: f32[16,32], index: 0, kind: input, shape index: {}]   ;;  %s740_s1 = inlined_call_operand.vmem [shape: f32[32,128], index: 1, kind: input, shape index: {}]   ;;  %s741_s2 = inlined_call_operand.vmem [shape: f32[1,128], index: 2, kind: input, shape index: {}]   ;;  %s742_s3 = inlined_call_operand.vmem [shape: f32[128,64], index: 3, kind: input, shape index: {}]   ;;  %s743_s4 = inlined_call_operand.vmem [shape: f32[1,64], index: 4, kind: input, shape index: {}]   ;;  %s744_s5 = inlined_call_operand.vmem [shape: f32[64,25], index: 5, kind: input, shape index: {}]   ;;  %s745_s6 = inlined_call_operand.vmem [shape: f32[1,25], index: 6, kind: input, shape index: {}]   ;;  %s746_s7 = inlined_call_operand.hbm [shape: f32[2,16,25], index: 7, kind: output, shape index: {}]  }
   0x1   :  { %v29_v0 = vld [vmem:[%s740_s1] sm:$0xff]  ;;  %v30_v1 = vld [vmem:[%s740_s1 + $0x8] sm:$0xff]  ;;  %v31_v2 = vld [vmem:[%s740_s1 + $0x10] sm:$0xff] }
   0x2   :  { %v482_v3 = vpack.c.bf16 %v30_v1, %v29_v0  ;;  %v32_v4 = vld [vmem:[%s740_s1 + $0x18] sm:$0xff]  ;;  %v27_v5 = vld [vmem:[%s739_s0] sm:$0xff]  ;;  %v125_v8 = vld [vmem:[%s742_s3 + $0x8] sm:$0xff] }
   0x3   :  { %v486_v6 = vpack.c.bf16 %v32_v4, %v31_v2  ;;  %425 = vmatprep.mubr.msk.f32.mxu0 %vm40_vm0, %v27_v5  ;;  %v124_v7 = vld [vmem:[%s742_s3] sm:$0xff]  ;;  %v126_v9 = vld [vmem:[%s742_s3 + $0x10] sm:$0xff]  ;;  %v127_v11 = vld [vmem:[%s742_s3 + $0x18] sm:$0xff] }
   0x4   :  { %483 = vmatprep.subr.bf16.mxu0 %v482_v3  ;;  %v490_v10 = vpack.c.bf16 %v125_v8, %v124_v7  ;;  %v494_v12 = vpack.c.bf16 %v127_v11, %v126_v9  ;;  %v128_v13 = vld [vmem:[%s742_s3 + $0x20] sm:$0xff]  ;;  %v129_v14 = vld [vmem:[%s742_s3 + $0x28] sm:$0xff] }
   0x5   :  { %485 = vmatpush3.bf16.msra.mxu0 %v482_v3 }
   0x6   :  { %487 = vmatprep.subr.bf16.mxu0 %v486_v6  ;;  %491 = vmatprep.subr.bf16.mxu1 %v490_v10 }
   0x7   :  { %493 = vmatpush3.bf16.msra.mxu1 %v490_v10 }
   0x8   :  { %12 = vsyncpa [#allocation3], 0  ;;  %495 = vmatprep.subr.bf16.mxu1 %v494_v12  ;;  %v498_v15 = vpack.c.bf16 %v129_v14, %v128_v13  ;;  %v28_v16 = vld [vmem:[%s739_s0 + $0x8] sm:$0xff]  ;;  %v130_v17 = vld [vmem:[%s742_s3 + $0x30] sm:$0xff]  ;;  %vm239_vm1 = vcmask 523264   ;;  %vm321_vm2 = vcmask 203776  }
   0x9   :  { %489 = vmatpush3.bf16.msra.mxu0 %v486_v6  ;;  %v131_v18 = vld [vmem:[%s742_s3 + $0x38] sm:$0xff]  ;;  %v132_v20 = vld [vmem:[%s742_s3 + $0x40] sm:$0xff]  ;;  %v133_v21 = vld [vmem:[%s742_s3 + $0x48] sm:$0xff] }
   0xa   :  { %v502_v19 = vpack.c.bf16 %v131_v18, %v130_v17  ;;  %v506_v22 = vpack.c.bf16 %v133_v21, %v132_v20  ;;  %v134_v23 = vld [vmem:[%s742_s3 + $0x50] sm:$0xff]  ;;  %v135_v24 = vld [vmem:[%s742_s3 + $0x58] sm:$0xff]  ;;  %v136_v26 = vld [vmem:[%s742_s3 + $0x60] sm:$0xff] }
   0xb   :  { %497 = vmatpush3.bf16.msra.mxu1 %v494_v12  ;;  %v510_v25 = vpack.c.bf16 %v135_v24, %v134_v23  ;;  %v137_v27 = vld [vmem:[%s742_s3 + $0x68] sm:$0xff]  ;;  %v138_v29 = vld [vmem:[%s742_s3 + $0x70] sm:$0xff]  ;;  %v139_v30 = vld [vmem:[%s742_s3 + $0x78] sm:$0xff] }
   0xc   :  { %426 = vmatmul.mubr.msk.f32.vlgmr.msra.gmra.mrb[0].mxu0 %vm40_vm0, %v28_v16  ;;  %499 = vmatprep.subr.bf16.mxu1 %v498_v15  ;;  %v514_v28 = vpack.c.bf16 %v137_v27, %v136_v26  ;;  %v518_v31 = vpack.c.bf16 %v139_v30, %v138_v29  ;;  %v224_v32 = vld [vmem:[%s744_s5] sm:$0xff]  ;;  %v225_v33 = vld [vmem:[%s744_s5 + $0x8] sm:$0xff]  ;;  %v226_v34 = vld [vmem:[%s744_s5 + $0x10] sm:$0xff] }
   0xd   :  { %v522_v35 = vpack.c.bf16 %v225_v33, %v224_v32  ;;  %v227_v36 = vld [vmem:[%s744_s5 + $0x18] sm:$0xff]  ;;  %v228_v38 = vld [vmem:[%s744_s5 + $0x20] sm:$0xff]  ;;  %v229_v39 = vld [vmem:[%s744_s5 + $0x28] sm:$0xff] }
   0xe   :  { %v526_v37 = vpack.c.bf16 %v227_v36, %v226_v34  ;;  %v530_v40 = vpack.c.bf16 %v229_v39, %v228_v38  ;;  %v376_v41 = vld [vmem:[%s741_s2] ss:$0 sm:$0xff]  ;;  %v230_v48 = vld [vmem:[%s744_s5 + $0x30] sm:$0xff]  ;;  %v231_v49 = vld [vmem:[%s744_s5 + $0x38] sm:$0xff] }
   0xf   :  { %501 = vmatpush3.bf16.msra.mxu1 %v498_v15  ;;  %523 = vmatprep.subr.bf16.mxu0 %v522_v35  ;;  %v534_v50 = vpack.c.bf16 %v231_v49, %v230_v48  ;;  %v379_v51 = vld [vmem:[%s743_s4] ss:$0 sm:$0xff]  ;;  %s573_s4 = smov [#allocation2]  }
  0x10   :  { %503 = vmatprep.subr.bf16.mxu1 %v502_v19  ;;  %525 = vmatpush3.bf16.msra.mxu0 %v522_v35  ;;  %v380_v58 = vld [vmem:[%s745_s6] ss:$0 sm:$0xff]  ;;  %s365_s5 = sshll.u32 %s573_s4, 4  ;;  %s366_s5 = int_to_ptr.vmem [resolvable:$true] %s365_s5 }
  0x11   :  { %527 = vmatprep.subr.bf16.mxu0 %v526_v37  ;;  %s549_s6 = scalar_lea.vmem %s366_s5, 512  ;;  %p554_p1 = scmp.lt.s32.totalorder %s366_s5, %s366_s5 }
  0x12   :  { %p550_p0 = scmp.ne.s32.totalorder %s366_s5, %s549_s6  ;;  %p555_p2 = scmp.lt.s32.totalorder %s549_s6, %s549_s6 }
  0x13   :  { %505 = vmatpush3.bf16.msra.mxu1 %v502_v19 }
  0x14   :  { %507 = vmatprep.subr.bf16.mxu1 %v506_v22  ;;  %529 = vmatpush3.bf16.msra.mxu0 %v526_v37  ;;  %p556_p3 = por %p555_p2, %p554_p1 }
  0x15   :  { %531 = vmatprep.subr.bf16.mxu0 %v530_v40 }
  0x16   :  { %p557_p4 = pnand %p556_p3, %p550_p0 }
  0x17   :  { %509 = vmatpush3.bf16.msra.mxu1 %v506_v22 }
  0x18   :  { %511 = vmatprep.subr.bf16.mxu1 %v510_v25  ;;  %533 = vmatpush3.bf16.msra.mxu0 %v530_v40 }
  0x19   :  { %535 = vmatprep.subr.bf16.mxu0 %v534_v50 }
  0x1b   :  { %513 = vmatpush3.bf16.msra.mxu1 %v510_v25 }
  0x1c   :  { %515 = vmatprep.subr.bf16.mxu1 %v514_v28  ;;  %537 = vmatpush3.bf16.msra.mxu0 %v534_v50 }
  0x1f   :  { %517 = vmatpush3.bf16.msra.mxu1 %v514_v28 }
  0x20   :  { %519 = vmatprep.subr.bf16.mxu1 %v518_v31 }
  0x23   :  { %521 = vmatpush3.bf16.msra.mxu1 %v518_v31 }
  0xdf   :  { %v427_v42 = vpop.f32.mrb[0].mxu0 }
  0xe0   :  { %v119_v43 = vadd.f32 %v427_v42, %v376_v41  ;;  %v113_v44 = vpop.f32.mrb[1].mxu0 }
  0xe1   :  { %v114_v45 = vadd.f32 %v376_v41, %v113_v44 }
  0xe2   :  { %v123_v47 = vmax.f32 %v119_v43, 0.0 }
  0xe3   :  { %v122_v46 = vmax.f32 %v114_v45, 0.0 }
  0xe5   :  { %460 = vmatprep.mubr.f32.mxu1 %v122_v46 }
  0xe6   :  { %461 = vmatmul.mubr.f32.vlgmr.msra.gmra.mrb[0].mxu1 %v123_v47 }
 0x1b9   :  { %v462_v52 = vpop.f32.mrb[0].mxu1 }
 0x1ba   :  { %v219_v53 = vadd.f32 %v462_v52, %v379_v51  ;;  %v213_v54 = vpop.f32.mrb[1].mxu1 }
 0x1bb   :  { %v214_v55 = vadd.f32 %v379_v51, %v213_v54 }
 0x1bc   :  { %v223_v57 = vmax.f32 %v219_v53, 0.0 }
 0x1bd   :  { %v222_v56 = vmax.f32 %v214_v55, 0.0 }
 0x1bf   :  { %479 = vmatprep.mubr.msk.f32.mxu0 %vm239_vm1, %v222_v56 }
 0x1c0   :  { %480 = vmatmul.mubr.msk.f32.vlgmr.msra.gmra.mrb[2].mxu0 %vm239_vm1, %v223_v57 }
 0x293   :  { %v481_v59 = vpop.f32.mrb[2].mxu0 }
 0x294   :  { %v312_v60 = vpop.f32.mrb[3].mxu0  ;;  %v318_v62 = vadd.f32 %v481_v59, %v380_v58 }
 0x295   :  { %v313_v61 = vadd.f32 %v380_v58, %v312_v60 }
 0x296   :  { %v325_v0 = vsel %vm321_vm2, %v318_v62, -inf  ;;  %v347_v15 = vsel %vm321_vm2, %v318_v62, 0.0 }
 0x297   :  { %v322_v63 = vsel %vm321_vm2, %v313_v61, -inf  ;;  %v344_v1 = vsel %vm321_vm2, %v313_v61, 0.0 }
 0x298   :  { %323 = vmax.xlane.f32.xlu0 %v322_v63 }
 0x29c   :  { %326 = vmax.xlane.f32.xlu0 %v325_v0 }
 0x2a0   :  { %345 = vadd.xlane.f32.xlu0 %v344_v1 }
 0x325   :  { %v324_v2 = vpop.xlane.xlu0 %323 }
 0x326   :  { %v328_v3 = vsub.f32 %v313_v61, %v324_v2 }
 0x328   :  { %v330_v4 = vmul.f32 1.442695, %v328_v3 }
 0x329   :  { %v327_v5 = vpop.xlane.xlu0 %326 }
 0x32a   :  { %541 = vpow2.f32 %v330_v4  ;;  %v329_v6 = vsub.f32 %v318_v62, %v327_v5 }
 0x32c   :  { %v332_v7 = vmul.f32 1.442695, %v329_v6 }
 0x32d   :  { %v346_v8 = vpop.xlane.xlu0 %345 }
 0x32e   :  { %543 = vpow2.f32 %v332_v7  ;;  %v351_v9 = vmul.f32 0.04, %v346_v8 }
 0x330   :  { %v353_v10 = vsub.f32 %v313_v61, %v351_v9 }
 0x332   :  { %355 = vst.msk [vmem:[#allocation2] sm:$0xff] %vm321_vm2, %v353_v10 }
 0x334   :  { %v542_v11 = vpop.eup %541 }
 0x335   :  { %v334_v12 = vsel %vm321_vm2, %v542_v11, 0.0 }
 0x336   :  { %335 = vadd.xlane.f32.xlu1 %v334_v12 }
 0x338   :  { %v544_v13 = vpop.eup %543 }
 0x339   :  { %v337_v14 = vsel %vm321_vm2, %v544_v13, 0.0 }
 0x33a   :  { %338 = vadd.xlane.f32.xlu1 %v337_v14 }
 0x33e   :  { %348 = vadd.xlane.f32.xlu1 %v347_v15 }
 0x3c3   :  { %v336_v16 = vpop.xlane.xlu1 %335 }
 0x3c4   :  { %545 = vrcp.f32 %v336_v16 }
 0x3c7   :  { %v339_v17 = vpop.xlane.xlu1 %338 }
 0x3c8   :  { %547 = vrcp.f32 %v339_v17 }
 0x3cb   :  { %v349_v18 = vpop.xlane.xlu1 %348 }
 0x3cc   :  { %v352_v19 = vmul.f32 0.04, %v349_v18 }
 0x3ce   :  { %v546_v20 = vpop.eup %545  ;;  %v354_v21 = vsub.f32 %v318_v62, %v352_v19 }
 0x3cf   :  { %v341_v22 = vmul.f32 %v546_v20, %v542_v11 }
 0x3d0   :  { %356 = vst.msk [vmem:[#allocation2 + $0x8] sm:$0xff] %vm321_vm2, %v354_v21 }
 0x3d1   :  { %358 = vst.msk [vmem:[#allocation2 + $0x10] sm:$0xff] %vm321_vm2, %v341_v22 }
 0x3d2   :  { %v548_v23 = vpop.eup %547 }
 0x3d3   :  { %v343_v24 = vmul.f32 %v548_v23, %v544_v13 }
 0x3d5   :  { %359 = vst.msk [vmem:[#allocation2 + $0x18] sm:$0xff] %vm321_vm2, %v343_v24 }
 0x3d6   :  { %560 = shalt.err (!%p557_p4)
}
 0x3d7   :  { %s561_s1 = scalar_lea.hbm %s746_s7, 512 }
 0x3d8   :  { %p562_p5 = scmp.ne.s32.totalorder %s746_s7, %s561_s1  ;;  %p565_p6 = scmp.lt.u32.totalorder %s561_s1, %s746_s7 }
 0x3da   :  { %p567_p7 = pnand %p565_p6, %p562_p5 }
 0x3dc   :  { %570 = shalt.err (!%p567_p7)
}
 0x3dd   :  { %s574_s21 = smov 128   ;;  %s575_s22 = smov 8  }
 0x3de   :  { %371 = dma.vmem_to_hbm [thread:$0]  %s366_s5, 512, %s746_s7, [#allocation3], %s574_s21, %s574_s21, %s575_s22  }
 0x3df   :  { %571 = dma.done.wait [#allocation3], 512  }
 0x3e0   :  { %572 = vsyncadd [#allocation3], 4294966784 }
 0x3e1   :  { %375 = vsyncpa [#allocation3], 1 }

</bundles_post_ra>
